<compile_context>
chip_gen: v5e
topology: v5e:2x2
jax: 0.10.0
libtpu: 0.0.40
codegen_flags: <defaults>
</compile_context>

<pallas_src>
import jax
import jax.numpy as jnp
from jax.experimental import pallas as pl
from jax.experimental.pallas import tpu as pltpu


def _round_up(x: int, m: int) -> int:
    return ((x + m - 1) // m) * m


def base_predictor_kernel(v_ref, q_ref,
                          w1_ref, b1_ref,      # v_net
                          w2_ref, b2_ref,      # classifier layer 1
                          w3_ref, b3_ref,      # classifier layer 2 (tiled over ans_dim)
                          out_ref,
                          m_ref):              # VMEM scratch: (TB, 2*hidden) bf16
    # Grid = (batch_tiles, ans_tiles).  The expensive shared prefix is computed once
    # per batch tile (at ans-tile 0) and cached in m_ref across the ans axis.
    @pl.when(pl.program_id(1) == 0)
    def _():
        # object-sum reduction over the (padded, zero-filled) objects axis.
        v_sum = jnp.sum(v_ref[...], axis=1)                              # (TB, v_dim) f32

        # v_net: Linear + ReLU   (bf16 MXU inputs, f32 accumulation)
        h = jnp.dot(v_sum.astype(w1_ref.dtype), w1_ref[...],
                    preferred_element_type=jnp.float32) + b1_ref[...]
        h = jnp.maximum(h, 0.0)

        # joint = q * v_net(v)   (elementwise gating, f32)
        joint = q_ref[...] * h

        # classifier layer 1: Linear + ReLU; cache ReLU output directly in bf16 so the
        # per-ans-tile matmul below needs no repeated cast.
        # TODO(synk): training-mode dropout (p=0.5) not implemented; inference only.
        m = jnp.dot(joint.astype(w2_ref.dtype), w2_ref[...],
                    preferred_element_type=jnp.float32) + b2_ref[...]
        m_ref[...] = jnp.maximum(m, 0.0).astype(m_ref.dtype)

    # classifier layer 2 on the current ans_dim tile (128-lane-dense stores).
    logits = jnp.dot(m_ref[...], w3_ref[...],
                     preferred_element_type=jnp.float32) + b3_ref[...]
    out_ref[...] = logits.astype(out_ref.dtype)


def base_predictor(v, q, params, *, weight_dtype=jnp.bfloat16,
                   batch_tile=None, ans_tile=None):
    """v: (B, O, v_dim) f32;  q: (B, hidden) f32;  params: dict of dense weights/biases."""
    B, O, v_dim = v.shape
    H = q.shape[1]
    H2 = params["w2"].shape[1]             # 2 * hidden
    ans_dim = params["w3"].shape[1]

    # ---- tiling / padding (sublane- and lane-aligned) ----------------------------
    TB = batch_tile or min(64, _round_up(B, 8))        # batch tile (multiple of 8, f32)
    B_pad = _round_up(B, TB)
    O_pad = _round_up(O, 8)                             # pad objects to a sublane multiple
    n128 = _round_up(ans_dim, 128)
    TN = ans_tile or min(512, n128)                     # ans_dim tile, 128-lane aligned
    N_pad = _round_up(n128, TN)

    v_p = jnp.pad(v.astype(jnp.float32), ((0, B_pad - B), (0, O_pad - O), (0, 0)))
    q_p = jnp.pad(q.astype(jnp.float32), ((0, B_pad - B), (0, 0)))

    w1 = params["w1"].astype(weight_dtype)
    w2 = params["w2"].astype(weight_dtype)
    w3 = jnp.pad(params["w3"], ((0, 0), (0, N_pad - ans_dim))).astype(weight_dtype)
    b1 = params["b1"].astype(jnp.float32)
    b2 = params["b2"].astype(jnp.float32)
    b3 = jnp.pad(params["b3"], ((0, 0), (0, N_pad - ans_dim))).astype(jnp.float32)

    grid = (B_pad // TB, N_pad // TN)

    # advisory cost estimate so XLA can overlap surrounding ops with this call
    flops = 2 * B_pad * (v_dim * H + H * H2 + H2 * N_pad) + B_pad * O_pad * v_dim
    bytes_accessed = (v_p.size * 4 + q_p.size * 4
                      + w1.size * w1.dtype.itemsize
                      + w2.size * w2.dtype.itemsize
                      + w3.size * w3.dtype.itemsize
                      + (b1.size + b2.size + b3.size) * 4
                      + B_pad * N_pad * 4)

    out = pl.pallas_call(
        base_predictor_kernel,
        out_shape=jax.ShapeDtypeStruct((B_pad, N_pad), jnp.float32),
        grid_spec=pltpu.PrefetchScalarGridSpec(
            num_scalar_prefetch=0,
            grid=grid,
            in_specs=[
                pl.BlockSpec((TB, O_pad, v_dim), lambda i, j: (i, 0, 0)),  # v  (batch-tiled)
                pl.BlockSpec((TB, H),            lambda i, j: (i, 0)),     # q  (batch-tiled)
                pl.BlockSpec((v_dim, H),         lambda i, j: (0, 0)),     # w1 (resident)
                pl.BlockSpec((1, H),             lambda i, j: (0, 0)),     # b1 (resident)
                pl.BlockSpec((H, H2),            lambda i, j: (0, 0)),     # w2 (resident)
                pl.BlockSpec((1, H2),            lambda i, j: (0, 0)),     # b2 (resident)
                pl.BlockSpec((H2, TN),           lambda i, j: (0, j)),     # w3 (ans-tiled)
                pl.BlockSpec((1, TN),            lambda i, j: (0, j)),     # b3 (ans-tiled)
            ],
            out_specs=pl.BlockSpec((TB, TN), lambda i, j: (i, j)),
            scratch_shapes=[pltpu.VMEM((TB, H2), jnp.bfloat16)],           # cached `m` (bf16)
        ),
        compiler_params=pltpu.CompilerParams(
            dimension_semantics=("parallel", "arbitrary"),   # megacore over batch tiles
            vmem_limit_bytes=48 * 1024 * 1024,               # fits v7x 64 MiB / v5e-v6e 128 MiB
        ),
        cost_estimate=pl.CostEstimate(flops=flops, transcendentals=0,
                                      bytes_accessed=bytes_accessed),
    )(v_p, q_p, w1, b1, w2, b2, w3, b3)

    return out[:B, :ans_dim]


def init_params(key, v_dim, hidden_dim, ans_dim):
    k1, k2, k3 = jax.random.split(key, 3)
    scale = 0.1
    return {
        # v_net: v_dim -> hidden
        "w1": scale * jax.random.normal(k1, (v_dim, hidden_dim), jnp.float32),
        "b1": jnp.zeros((1, hidden_dim), jnp.float32),
        # classifier layer 1: hidden -> 2*hidden
        "w2": scale * jax.random.normal(k2, (hidden_dim, 2 * hidden_dim), jnp.float32),
        "b2": jnp.zeros((1, 2 * hidden_dim), jnp.float32),
        # classifier layer 2: 2*hidden -> ans_dim
        "w3": scale * jax.random.normal(k3, (2 * hidden_dim, ans_dim), jnp.float32),
        "b3": jnp.zeros((1, ans_dim), jnp.float32),
    }


if __name__ == "__main__":
    B, num_objs, v_dim, hidden_dim, ans_dim = 2, 4, 16, 32, 10

    key = jax.random.PRNGKey(0)
    kv, kq, kp = jax.random.split(key, 3)

    v = jax.random.normal(kv, (B, num_objs, v_dim), jnp.float32)   # batch['v']
    q = jax.random.normal(kq, (B, hidden_dim), jnp.float32)        # batch['q']
    params = init_params(kp, v_dim, hidden_dim, ans_dim)

    out = base_predictor(v, q, params)
    jax.block_until_ready(out)

    # Pure-JAX reference mimicking the kernel's bf16 weights / f32 accumulation.
    wdt = jnp.bfloat16
    w1 = params["w1"].astype(wdt)
    w2 = params["w2"].astype(wdt)
    w3 = params["w3"].astype(wdt)
    v_sum = v.sum(1)
    h = jnp.maximum(jnp.dot(v_sum.astype(wdt), w1,
                            preferred_element_type=jnp.float32) + params["b1"], 0.0)
    joint = q * h
    m = jnp.maximum(jnp.dot(joint.astype(wdt), w2,
                            preferred_element_type=jnp.float32) + params["b2"], 0.0)
    ref = jnp.dot(m.astype(wdt), w3,
                  preferred_element_type=jnp.float32) + params["b3"]

    assert out.shape == (B, ans_dim)
    assert jnp.allclose(out, ref, atol=1e-3, rtol=1e-3), float(jnp.max(jnp.abs(out - ref)))

    print("KERNEL_OK")
</pallas_src>

<mosaic_0001>
module attributes {stable_mosaic.version = 11 : i64} {
  func.func @base_predictor_kernel(%arg0: i32, %arg1: i32, %arg2: memref<8x8x16xf32, #tpu.memory_space<vmem>>, %arg3: memref<8x32xf32, #tpu.memory_space<vmem>>, %arg4: memref<16x32xbf16, #tpu.memory_space<vmem>>, %arg5: memref<1x32xf32, #tpu.memory_space<vmem>>, %arg6: memref<32x64xbf16, #tpu.memory_space<vmem>>, %arg7: memref<1x64xf32, #tpu.memory_space<vmem>>, %arg8: memref<64x128xbf16, #tpu.memory_space<vmem>>, %arg9: memref<1x128xf32, #tpu.memory_space<vmem>>, %arg10: memref<8x128xf32, #tpu.memory_space<vmem>>, %arg11: memref<8x64xbf16, #tpu.memory_space<vmem>>) attributes {dimension_semantics = [#tpu.dimension_semantics<parallel>, #tpu.dimension_semantics<arbitrary>], iteration_bounds = array<i64: 1, 1>, scalar_prefetch = 0 : i64, scratch_operands = 1 : i64, tpu.core_type = #tpu.core_type<tc>, window_params = [{transform_indices = @transform_0, window_bounds = array<i64: 8, 8, 16>}, {transform_indices = @transform_1, window_bounds = array<i64: 8, 32>}, {pipeline_mode = #tpu.pipeline_mode<synchronous>, transform_indices = @transform_2, window_bounds = array<i64: 16, 32>}, {pipeline_mode = #tpu.pipeline_mode<synchronous>, transform_indices = @transform_3, window_bounds = array<i64: 1, 32>}, {pipeline_mode = #tpu.pipeline_mode<synchronous>, transform_indices = @transform_4, window_bounds = array<i64: 32, 64>}, {pipeline_mode = #tpu.pipeline_mode<synchronous>, transform_indices = @transform_5, window_bounds = array<i64: 1, 64>}, {transform_indices = @transform_6, window_bounds = array<i64: 64, 128>}, {transform_indices = @transform_7, window_bounds = array<i64: 1, 128>}, {transform_indices = @transform_8, window_bounds = array<i64: 8, 128>}]} {
    %c0_i32 = arith.constant 0 : i32
    %0 = arith.cmpi eq, %arg1, %c0_i32 : i32
    %1 = arith.extui %0 : i1 to i32
    %c0_i32_0 = arith.constant 0 : i32
    %2 = arith.cmpi ne, %1, %c0_i32_0 : i32
    scf.if %2 {
      %c0_8 = arith.constant 0 : index
      %c0_9 = arith.constant 0 : index
      %c0_10 = arith.constant 0 : index
      %10 = vector.load %arg2[%c0_8, %c0_9, %c0_10] : memref<8x8x16xf32, #tpu.memory_space<vmem>>, vector<8x8x16xf32>
      %cst_11 = arith.constant dense<0.000000e+00> : vector<8x16xf32>
      %11 = vector.multi_reduction <add>, %10, %cst_11 [1] : vector<8x8x16xf32> to vector<8x16xf32>
      %12 = arith.truncf %11 : vector<8x16xf32> to vector<8x16xbf16>
      %c0_12 = arith.constant 0 : index
      %c0_13 = arith.constant 0 : index
      %13 = vector.load %arg4[%c0_12, %c0_13] : memref<16x32xbf16, #tpu.memory_space<vmem>>, vector<16x32xbf16>
      %cst_14 = arith.constant dense<0.000000e+00> : vector<8x32xf32>
      %14 = tpu.matmul %12, %13, %cst_14 {dimension_numbers = #tpu.dot_dimension_numbers<[1], [0], [0], [1], [0, 0, 1, 1], [], []>} : vector<8x16xbf16>, vector<16x32xbf16>, vector<8x32xf32> -> vector<8x32xf32>
      %c0_15 = arith.constant 0 : index
      %c0_16 = arith.constant 0 : index
      %15 = vector.load %arg5[%c0_15, %c0_16] : memref<1x32xf32, #tpu.memory_space<vmem>>, vector<1x32xf32>
      %16 = vector.broadcast %15 : vector<1x32xf32> to vector<8x32xf32>
      %17 = arith.addf %14, %16 : vector<8x32xf32>
      %cst_17 = arith.constant 0.000000e+00 : f32
      %18 = vector.broadcast %cst_17 : f32 to vector<8x32xf32>
      %19 = arith.maximumf %17, %18 : vector<8x32xf32>
      %c0_18 = arith.constant 0 : index
      %c0_19 = arith.constant 0 : index
      %20 = vector.load %arg3[%c0_18, %c0_19] : memref<8x32xf32, #tpu.memory_space<vmem>>, vector<8x32xf32>
      %21 = arith.mulf %20, %19 : vector<8x32xf32>
      %22 = arith.truncf %21 : vector<8x32xf32> to vector<8x32xbf16>
      %c0_20 = arith.constant 0 : index
      %c0_21 = arith.constant 0 : index
      %23 = vector.load %arg6[%c0_20, %c0_21] : memref<32x64xbf16, #tpu.memory_space<vmem>>, vector<32x64xbf16>
      %cst_22 = arith.constant dense<0.000000e+00> : vector<8x64xf32>
      %24 = tpu.matmul %22, %23, %cst_22 {dimension_numbers = #tpu.dot_dimension_numbers<[1], [0], [0], [1], [0, 0, 1, 1], [], []>} : vector<8x32xbf16>, vector<32x64xbf16>, vector<8x64xf32> -> vector<8x64xf32>
      %c0_23 = arith.constant 0 : index
      %c0_24 = arith.constant 0 : index
      %25 = vector.load %arg7[%c0_23, %c0_24] : memref<1x64xf32, #tpu.memory_space<vmem>>, vector<1x64xf32>
      %26 = vector.broadcast %25 : vector<1x64xf32> to vector<8x64xf32>
      %27 = arith.addf %24, %26 : vector<8x64xf32>
      %cst_25 = arith.constant 0.000000e+00 : f32
      %28 = vector.broadcast %cst_25 : f32 to vector<8x64xf32>
      %29 = arith.maximumf %27, %28 : vector<8x64xf32>
      %30 = arith.truncf %29 : vector<8x64xf32> to vector<8x64xbf16>
      %c0_26 = arith.constant 0 : index
      %c0_27 = arith.constant 0 : index
      %31 = vector.load %arg11[%c0_26, %c0_27] : memref<8x64xbf16, #tpu.memory_space<vmem>>, vector<8x64xbf16>
      tpu.vector_store %arg11[%c0_26, %c0_27], %30 {strides = array<i32>} : memref<8x64xbf16, #tpu.memory_space<vmem>>, vector<8x64xbf16>,
    } else {
    }
    %c0 = arith.constant 0 : index
    %c0_1 = arith.constant 0 : index
    %3 = vector.load %arg11[%c0, %c0_1] : memref<8x64xbf16, #tpu.memory_space<vmem>>, vector<8x64xbf16>
    %c0_2 = arith.constant 0 : index
    %c0_3 = arith.constant 0 : index
    %4 = vector.load %arg8[%c0_2, %c0_3] : memref<64x128xbf16, #tpu.memory_space<vmem>>, vector<64x128xbf16>
    %cst = arith.constant dense<0.000000e+00> : vector<8x128xf32>
    %5 = tpu.matmul %3, %4, %cst {dimension_numbers = #tpu.dot_dimension_numbers<[1], [0], [0], [1], [0, 0, 1, 1], [], []>} : vector<8x64xbf16>, vector<64x128xbf16>, vector<8x128xf32> -> vector<8x128xf32>
    %c0_4 = arith.constant 0 : index
    %c0_5 = arith.constant 0 : index
    %6 = vector.load %arg9[%c0_4, %c0_5] : memref<1x128xf32, #tpu.memory_space<vmem>>, vector<1x128xf32>
    %7 = vector.broadcast %6 : vector<1x128xf32> to vector<8x128xf32>
    %8 = arith.addf %5, %7 : vector<8x128xf32>
    %c0_6 = arith.constant 0 : index
    %c0_7 = arith.constant 0 : index
    %9 = vector.load %arg10[%c0_6, %c0_7] : memref<8x128xf32, #tpu.memory_space<vmem>>, vector<8x128xf32>
    tpu.vector_store %arg10[%c0_6, %c0_7], %8 {strides = array<i32>} : memref<8x128xf32, #tpu.memory_space<vmem>>, vector<8x128xf32>,
    return
  }
  func.func @transform_0(%arg0: i32, %arg1: i32) -> (i32, i32, i32) {
    %c0_i32 = arith.constant 0 : i32
    %c0_i32_0 = arith.constant 0 : i32
    %c0_i32_1 = arith.constant 0 : i32
    return %arg0, %c0_i32, %c0_i32_0 : i32, i32, i32
  }
  func.func @transform_1(%arg0: i32, %arg1: i32) -> (i32, i32) {
    %c0_i32 = arith.constant 0 : i32
    %c0_i32_0 = arith.constant 0 : i32
    return %arg0, %c0_i32 : i32, i32
  }
  func.func @transform_2(%arg0: i32, %arg1: i32) -> (i32, i32) {
    %c0_i32 = arith.constant 0 : i32
    %c0_i32_0 = arith.constant 0 : i32
    %c0_i32_1 = arith.constant 0 : i32
    return %c0_i32, %c0_i32_0 : i32, i32
  }
  func.func @transform_3(%arg0: i32, %arg1: i32) -> (i32, i32) {
    %c0_i32 = arith.constant 0 : i32
    %c0_i32_0 = arith.constant 0 : i32
    %c0_i32_1 = arith.constant 0 : i32
    return %c0_i32, %c0_i32_0 : i32, i32
  }
  func.func @transform_4(%arg0: i32, %arg1: i32) -> (i32, i32) {
    %c0_i32 = arith.constant 0 : i32
    %c0_i32_0 = arith.constant 0 : i32
    %c0_i32_1 = arith.constant 0 : i32
    return %c0_i32, %c0_i32_0 : i32, i32
  }
  func.func @transform_5(%arg0: i32, %arg1: i32) -> (i32, i32) {
    %c0_i32 = arith.constant 0 : i32
    %c0_i32_0 = arith.constant 0 : i32
    %c0_i32_1 = arith.constant 0 : i32
    return %c0_i32, %c0_i32_0 : i32, i32
  }
  func.func @transform_6(%arg0: i32, %arg1: i32) -> (i32, i32) {
    %c0_i32 = arith.constant 0 : i32
    %c0_i32_0 = arith.constant 0 : i32
    return %c0_i32, %arg1 : i32, i32
  }
  func.func @transform_7(%arg0: i32, %arg1: i32) -> (i32, i32) {
    %c0_i32 = arith.constant 0 : i32
    %c0_i32_0 = arith.constant 0 : i32
    return %c0_i32, %arg1 : i32, i32
  }
  func.func @transform_8(%arg0: i32, %arg1: i32) -> (i32, i32) {
    %c0_i32 = arith.constant 0 : i32
    return %arg0, %arg1 : i32, i32
  }
}

</mosaic_0001>

<bundles_post_ra>
// kernel: tpu_custom_call.1
= control target key start
LH: loop header
LB: loop body
LE: loop exit
PB: predicated region body
PF: predicated region fallthrough
CT: control target
= control target key end

     0   :  { %13 = vsyncpa [#allocation4], 0  ;;  %s660_s0 = inlined_call_operand.hbm [shape: f32[8,8,16], index: 0, kind: input, shape index: {}]   ;;  %s661_s1 = inlined_call_operand.hbm [shape: f32[8,32], index: 1, kind: input, shape index: {}]   ;;  %s662_s2 = inlined_call_operand.hbm [shape: bf16[16,32], index: 2, kind: input, shape index: {}]   ;;  %s663_s3 = inlined_call_operand.vmem [shape: f32[1,32], index: 3, kind: input, shape index: {}]   ;;  %s664_s4 = inlined_call_operand.hbm [shape: bf16[32,64], index: 4, kind: input, shape index: {}]   ;;  %s665_s5 = inlined_call_operand.vmem [shape: f32[1,64], index: 5, kind: input, shape index: {}]   ;;  %s666_s6 = inlined_call_operand.hbm [shape: bf16[64,128], index: 6, kind: input, shape index: {}]   ;;  %s667_s7 = inlined_call_operand.vmem [shape: f32[1,128], index: 7, kind: input, shape index: {}]   ;;  %s668_s8 = inlined_call_operand.hbm [shape: f32[8,128], index: 8, kind: output, shape index: {}]  }
   0x1   :  { %14 = vsyncpa [#allocation7], 0 }
   0x2   :  { %15 = vsyncpa [#allocation10], 0  ;;  %s35_s29 = sshll.u32 %s661_s1, 4  ;;  %s36_s29 = int_to_ptr.hbm [resolvable:$true] %s35_s29 }
   0x3   :  { %16 = vsyncpa [#allocation5], 0  ;;  %s565_s30 = smov [#allocation6]   ;;  %s60_s12 = sshll.u32 %s664_s4, 4  ;;  %s61_s12 = int_to_ptr.hbm [resolvable:$true] %s60_s12 }
   0x4   :  { %s37_s9 = sshll.u32 %s565_s30, 4  ;;  %s566_s13 = smov [#allocation9]   ;;  %s38_s9 = int_to_ptr.vmem [resolvable:$true] %s37_s9 }
   0x5   :  { %40 = dma.hbm_to_vmem [thread:$0]  %s36_s29, 128, %s38_s9, [#allocation7]  }
   0x6   :  { %s62_s14 = sshll.u32 %s566_s13, 4  ;;  %s21_s17 = sshll.u32 %s660_s0, 4  ;;  %s63_s14 = int_to_ptr.vmem [resolvable:$true] %s62_s14  ;;  %s22_s17 = int_to_ptr.hbm [resolvable:$true] %s21_s17 }
   0x7   :  { %s567_s1 = smov 64   ;;  %s568_s18 = smov 4  }
   0x8   :  { %68 = dma.hbm_to_vmem [thread:$0]  %s61_s12, 256, %s63_s14, [#allocation10], %s567_s1, %s567_s1, %s568_s18  }
   0x9   :  { %s569_s19 = smov [#allocation3]   ;;  %s45_s23 = sshll.u32 %s662_s2, 4  ;;  %s46_s23 = int_to_ptr.hbm [resolvable:$true] %s45_s23 }
   0xa   :  { %s23_s20 = sshll.u32 %s569_s19, 4  ;;  %s570_s4 = smov 128   ;;  %s24_s20 = int_to_ptr.vmem [resolvable:$true] %s23_s20 }
   0xb   :  { %s571_s24 = smov 8   ;;  %s572_s25 = smov [#allocation8]  }
   0xc   :  { %29 = dma.hbm_to_vmem [thread:$0]  %s22_s17, 1024, %s24_s20, [#allocation4], %s570_s4, %s570_s4, %s571_s24  }
   0xd   :  { %s47_s26 = sshll.u32 %s572_s25, 4  ;;  %s75_s28 = sshll.u32 %s666_s6, 4  ;;  %s48_s26 = int_to_ptr.vmem [resolvable:$true] %s47_s26  ;;  %s76_s28 = int_to_ptr.hbm [resolvable:$true] %s75_s28 }
   0xe   :  { %53 = dma.hbm_to_vmem [thread:$0]  %s46_s23, 128, %s48_s26, [#allocation7], %s567_s1, %s567_s1, %s568_s18  }
   0xf   :  { %s573_s29 = smov [#allocation11]  }
  0x10   :  { %s77_s30 = sshll.u32 %s573_s29, 4  ;;  %s78_s30 = int_to_ptr.vmem [resolvable:$true] %s77_s30 }
  0x11   :  { %83 = dma.hbm_to_vmem [thread:$0]  %s76_s28, 512, %s78_s30, [#allocation10], %s567_s1, %s567_s1, %s568_s18  }
  0x12   :  { %557 = dma.done.wait [#allocation4], 1024  }
  0x13   :  { %558 = vsyncadd [#allocation4], 4294966272 }
  0x14   :  { %559 = dma.done.wait [#allocation7], 256  }
  0x15   :  { %560 = vsyncadd [#allocation7], 4294967040 }
  0x16   :  { %561 = dma.done.wait [#allocation10], 768  }
  0x17   :  { %562 = vsyncadd [#allocation10], 4294966528  ;;  %vm119_vm0 = vcmask 130048   ;;  %v393_v0 = vld [vmem:[#allocation8] sm:$0xff]  ;;  %v111_v1 = vld [vmem:[#allocation3] sm:$0xff]  ;;  %vm206_vm1 = vcmask 1041409  }
  0x18   :  { %v112_v2 = vld [vmem:[#allocation3 + $0x8] sm:$0xff]  ;;  %v113_v3 = vld [vmem:[#allocation3 + $0x10] sm:$0xff]  ;;  %v114_v4 = vld [vmem:[#allocation3 + $0x18] sm:$0xff]  ;;  %v120_v6 = vsel %vm119_vm0, %v111_v1, 0.0  ;;  %237 = vmatpush.bf16.msra.mxu0 %v393_v0  ;;  %vm208_vm2 = vcmask 1042434   ;;  %vm210_vm3 = vcmask 1043459  }
  0x19   :  { %v115_v5 = vld [vmem:[#allocation3 + $0x20] sm:$0xff]  ;;  %v127_v7 = vsel %vm119_vm0, %v112_v2, 0.0  ;;  %v116_v8 = vld [vmem:[#allocation3 + $0x28] sm:$0xff]  ;;  %v117_v9 = vld [vmem:[#allocation3 + $0x30] sm:$0xff]  ;;  %v121_v11 = vrot.slane %v120_v6, 4  ;;  %v134_v13 = vsel %vm119_vm0, %v113_v3, 0.0 }
  0x1a   :  { %v118_v10 = vld [vmem:[#allocation3 + $0x38] sm:$0xff]  ;;  %v128_v12 = vrot.slane %v127_v7, 4  ;;  %v135_v14 = vrot.slane %v134_v13, 4  ;;  %v141_v15 = vsel %vm119_vm0, %v114_v4, 0.0  ;;  %v148_v16 = vsel %vm119_vm0, %v115_v5, 0.0  ;;  %s574_s12 = smov [#allocation12]  }
  0x1b   :  { %v155_v17 = vsel %vm119_vm0, %v116_v8, 0.0  ;;  %v122_v18 = vadd.f32 %v121_v11, %v120_v6  ;;  %v142_v20 = vrot.slane %v141_v15, 4  ;;  %v149_v21 = vrot.slane %v148_v16, 4  ;;  %s348_s13 = sshll.u32 %s574_s12, 4  ;;  %s349_s13 = int_to_ptr.vmem [resolvable:$true] %s348_s13 }
  0x1c   :  { %v129_v19 = vadd.f32 %v128_v12, %v127_v7  ;;  %v136_v22 = vadd.f32 %v135_v14, %v134_v13  ;;  %v156_v23 = vrot.slane %v155_v17, 4  ;;  %v162_v24 = vsel %vm119_vm0, %v117_v9, 0.0 }
  0x1d   :  { %v169_v25 = vsel %vm119_vm0, %v118_v10, 0.0  ;;  %v123_v26 = vrot.slane %v122_v18, 2  ;;  %v143_v28 = vadd.f32 %v142_v20, %v141_v15  ;;  %v150_v29 = vadd.f32 %v149_v21, %v148_v16 }
  0x1e   :  { %v130_v27 = vrot.slane %v129_v19, 2  ;;  %v137_v30 = vrot.slane %v136_v22, 2  ;;  %v157_v31 = vadd.f32 %v156_v23, %v155_v17  ;;  %v163_v32 = vrot.slane %v162_v24, 4 }
  0x1f   :  { %v170_v33 = vrot.slane %v169_v25, 4  ;;  %v124_v34 = vadd.f32 %v123_v26, %v122_v18  ;;  %v144_v36 = vrot.slane %v143_v28, 2  ;;  %v151_v37 = vrot.slane %v150_v29, 2  ;;  %v394_v26 = vld [vmem:[#allocation9] sm:$0xff] }
  0x20   :  { %v131_v35 = vadd.f32 %v130_v27, %v129_v19  ;;  %v138_v38 = vadd.f32 %v137_v30, %v136_v22  ;;  %v158_v39 = vrot.slane %v157_v31, 2  ;;  %v164_v40 = vadd.f32 %v163_v32, %v162_v24  ;;  %v410_v27 = vld [vmem:[%s663_s3] ss:$0 sm:$0xff]  ;;  %v244_v30 = vld [vmem:[#allocation6] sm:$0xff] }
  0x21   :  { %v171_v41 = vadd.f32 %v170_v33, %v169_v25  ;;  %v125_v42 = vrot.slane %v124_v34, 1  ;;  %v145_v44 = vadd.f32 %v144_v36, %v143_v28  ;;  %v152_v45 = vadd.f32 %v151_v37, %v150_v29  ;;  %v395_v25 = vld [vmem:[#allocation9 + $0x8] sm:$0xff]  ;;  %v398_v36 = vld [vmem:[#allocation11 + $0x10] sm:$0xff]  ;;  %v397_v37 = vld [vmem:[#allocation11 + $0x8] sm:$0xff] }
  0x22   :  { %v132_v43 = vrot.slane %v131_v35, 1  ;;  %vm212_vm4 = vcmask 1044484   ;;  %v139_v46 = vrot.slane %v138_v38, 1  ;;  %v159_v47 = vadd.f32 %v158_v39, %v157_v31  ;;  %277 = vmatpush.bf16.msra.mxu1 %v395_v25  ;;  %v411_v39 = vld [vmem:[%s665_s5] ss:$0 sm:$0xff]  ;;  %s350_s5 = sshll.u32 %s668_s8, 4  ;;  %s351_s5 = int_to_ptr.hbm [resolvable:$true] %s350_s5 }
  0x23   :  { %v165_v48 = vrot.slane %v164_v40, 2  ;;  %v172_v49 = vrot.slane %v171_v41, 2  ;;  %v126_v50 = vadd.f32 %v125_v42, %v124_v34  ;;  %v146_v52 = vrot.slane %v145_v44, 1 }
  0x24   :  { %v133_v51 = vadd.f32 %v132_v43, %v131_v35  ;;  %v153_v53 = vrot.slane %v152_v45, 1  ;;  %v140_v54 = vadd.f32 %v139_v46, %v138_v38  ;;  %v160_v55 = vrot.slane %v159_v47, 1  ;;  %v399_v35 = vld [vmem:[#allocation11 + $0x18] sm:$0xff]  ;;  %v396_v38 = vld [vmem:[#allocation11] sm:$0xff] }
  0x25   :  { %v166_v56 = vadd.f32 %v165_v48, %v164_v40  ;;  %v173_v57 = vadd.f32 %v172_v49, %v171_v41  ;;  %v147_v58 = vadd.f32 %v146_v52, %v145_v44  ;;  %v176_v60 = vpack.c.bf16 %v126_v50, %v126_v50  ;;  %333 = vmatpush.bf16.msra.mxu2 %v399_v35  ;;  %v412_v46 = vld [vmem:[%s667_s7] ss:$0 sm:$0xff] }
  0x26   :  { %v154_v59 = vadd.f32 %v153_v53, %v152_v45  ;;  %v177_v61 = vpack.c.bf16 %v133_v51, %v133_v51  ;;  %v161_v62 = vadd.f32 %v160_v55, %v159_v47  ;;  %v178_v1 = vpack.c.bf16 %v140_v54, %v140_v54  ;;  %278 = vmatpush.bf16.msra.mxu1 %v394_v26 }
  0x27   :  { %v167_v63 = vrot.slane %v166_v56, 1  ;;  %v174_v0 = vrot.slane %v173_v57, 1  ;;  %v179_v2 = vpack.c.bf16 %v147_v58, %v147_v58  ;;  %v198_v4 = vunpack.c.l.b16 %v176_v60 }
  0x28   :  { %v180_v3 = vpack.c.bf16 %v154_v59, %v154_v59  ;;  %v199_v5 = vunpack.c.l.b16 %v177_v61  ;;  %v181_v8 = vpack.c.bf16 %v161_v62, %v161_v62  ;;  %v200_v9 = vunpack.c.l.b16 %v178_v1 }
  0x29   :  { %v168_v6 = vadd.f32 %v167_v63, %v166_v56  ;;  %v175_v7 = vadd.f32 %v174_v0, %v173_v57  ;;  %v201_v10 = vunpack.c.l.b16 %v179_v2  ;;  %vm214_vm5 = vcmask 1045509   ;;  %334 = vmatpush.bf16.msra.mxu2 %v398_v36 }
  0x2a   :  { %v202_v11 = vunpack.c.l.b16 %v180_v3  ;;  %v207_v12 = vsel %vm206_vm1, %v199_v5, %v198_v4  ;;  %v203_v15 = vunpack.c.l.b16 %v181_v8  ;;  %vm216_vm6 = vcmask 1046534  }
  0x2b   :  { %v182_v13 = vpack.c.bf16 %v168_v6, %v168_v6  ;;  %v183_v14 = vpack.c.bf16 %v175_v7, %v175_v7  ;;  %v209_v16 = vsel %vm208_vm2, %v200_v9, %v207_v12  ;;  %vm218_vm7 = vcmask 1047559  }
  0x2c   :  { %v211_v17 = vsel %vm210_vm3, %v201_v10, %v209_v16  ;;  %vm267_vm8 = vcmask 261120   ;;  %vm286_vm9 = vcmask 519168   ;;  %vm325_vm10 = vcmask 523264  }
  0x2d   :  { %v204_v18 = vunpack.c.l.b16 %v182_v13  ;;  %v205_v19 = vunpack.c.l.b16 %v183_v14  ;;  %v213_v20 = vsel %vm212_vm4, %v202_v11, %v211_v17  ;;  %335 = vmatpush.bf16.msra.mxu2 %v397_v37 }
  0x2e   :  { %v215_v21 = vsel %vm214_vm5, %v203_v15, %v213_v20 }
  0x2f   :  { %v217_v22 = vsel %vm216_vm6, %v204_v18, %v215_v21 }
  0x30   :  { %v219_v23 = vsel %vm218_vm7, %v205_v19, %v217_v22 }
  0x31   :  { %v220_v24 = vpack.c.b16 %v219_v23, %v219_v23  ;;  %336 = vmatpush.bf16.msra.mxu2 %v396_v38 }
  0x33   :  { %366 = vmatmul.msk.bf16.vlgmr.msra.gmra.mxu0 %vm119_vm0, %v220_v24 }
  0xb0   :  { %v239_v28 = vpop.f32.mrf.mxu0 }
  0xb1   :  { %v240_v29 = vadd.f32 %v410_v27, %v239_v28 }
  0xb3   :  { %v243_v31 = vmax.f32 %v240_v29, 0.0 }
  0xb5   :  { %v245_v32 = vmul.f32 %v244_v30, %v243_v31 }
  0xb7   :  { %v246_v33 = vpack.c.bf16 %v245_v32, %v245_v32 }
  0xb8   :  { %v241_v34 = vpop.f32.mrf.mxu0 }
  0xb9   :  { %375 = vmatmul.msk.bf16.vlgmr.msra.gmra.mxu1 %vm267_vm8, %v246_v33 }
 0x136   :  { %v280_v40 = vpop.f32.mrf.mxu1 }
 0x137   :  { %v281_v41 = vadd.f32 %v411_v39, %v280_v40 }
 0x139   :  { %v284_v42 = vmax.f32 %v281_v41, 0.0 }
 0x13b   :  { %v285_v43 = vpack.c.bf16 %v284_v42, %v284_v42 }
 0x13d   :  { %287 = vst.msk [vmem:[#allocation2] sm:$0xf] %vm286_vm9, %v285_v43 }
 0x13e   :  { %v282_v44 = vpop.f32.mrf.mxu1 }
 0x144   :  { %v288_v45 = vld [vmem:[#allocation2] sm:$0xf] }
 0x145   :  { %392 = vmatmul.msk.bf16.vlgmr.msra.gmra.mxu2 %vm325_vm10, %v288_v45 }
 0x1c8   :  { %v338_v47 = vpop.f32.mrf.mxu2 }
 0x1c9   :  { %v339_v48 = vadd.f32 %v412_v46, %v338_v47 }
 0x1cb   :  { %342 = vst [vmem:[#allocation12] sm:$0xff] %v339_v48 }
 0x1cc   :  { %353 = dma.vmem_to_hbm [thread:$0]  %s349_s13, 128, %s351_s5, [#allocation5]  }
 0x1d0   :  { %v340_v49 = vpop.f32.mrf.mxu2 }
 0x1d1   :  { %563 = dma.done.wait [#allocation5], 128  }
 0x1d2   :  { %564 = vsyncadd [#allocation5], 4294967168 }
 0x1d3   :  { %358 = vsyncpa [#allocation4], 1 }
 0x1d4   :  { %359 = vsyncpa [#allocation7], 1 }
 0x1d5   :  { %360 = vsyncpa [#allocation10], 1 }
 0x1d6   :  { %361 = vsyncpa [#allocation5], 1 }

</bundles_post_ra>
